<compile_context>
chip_gen: v7x
topology: tpu7x:2x2x1
jax: 0.10.0
libtpu: 0.0.40
codegen_flags: <defaults>
</compile_context>

<pallas_src>
import functools
import numpy as np

import jax
import jax.numpy as jnp
from jax.experimental import pallas as pl
from jax.experimental.pallas import tpu as pltpu


# --------------------------------------------------------------------------
# Pallas kernel.  Per batch tile (Bt samples along lanes):
#   P = [[Ur,-Ui],[Ui,Ur]] @ [Er; Ei]   -> top half = Re(Psi^T), bottom = Im(Psi^T)
#   out[a*dA + c, b] = sum_k Psi[a*dB + k, b] * conj(Psi[c*dB + k, b])
# U_perm rows are ordered kept-subsystem-index (a) major, traced-index (k)
# minor, so each (a, c) contraction is a contiguous static sublane slice.
# --------------------------------------------------------------------------
def _qulinear_kernel(e_ref, u_ref, out_ref, *, dA, dB):
    # One real MXU matmul implements the complex product Psi^T = U_perm @ E.
    p = jnp.dot(u_ref[...], e_ref[...], preferred_element_type=jnp.float32)
    n = dA * dB
    pr = p[:n, :]                       # (dA*dB, Bt)  Re(Psi^T)
    pi = p[n:, :]                       # (dA*dB, Bt)  Im(Psi^T)

    # Partial-trace / reduced-DM contraction, batch kept lane-dense.
    rows_r = []
    rows_i = []
    for a in range(dA):
        ar = pr[a * dB:(a + 1) * dB, :]          # (dB, Bt) static sublane slices
        ai = pi[a * dB:(a + 1) * dB, :]
        for c in range(dA):
            cr = pr[c * dB:(c + 1) * dB, :]
            ci = pi[c * dB:(c + 1) * dB, :]
            rows_r.append(jnp.sum(ar * cr + ai * ci, axis=0, keepdims=True))
            rows_i.append(jnp.sum(ai * cr - ar * ci, axis=0, keepdims=True))
    # Single lane-dense store: first dA*dA rows real, last dA*dA rows imag.
    out_ref[...] = jnp.concatenate(rows_r + rows_i, axis=0)      # (2*dA*dA, Bt)


# --------------------------------------------------------------------------
# Plain-JAX glue: variational circuit unitary (data independent) and the
# per-batch encoding column (U_encoding @ |0...0>).
# --------------------------------------------------------------------------
def _ry(theta):
    c = jnp.cos(theta / 2).astype(jnp.complex64)
    s = jnp.sin(theta / 2).astype(jnp.complex64)
    return jnp.stack([jnp.stack([c, -s]), jnp.stack([s, c])])


def _rz(theta):
    e = jnp.exp(-0.5j * theta.astype(jnp.complex64))
    z = jnp.zeros((), jnp.complex64)
    return jnp.stack([jnp.stack([e, z]), jnp.stack([z, jnp.conj(e)])])


def _embed(gate2, q, n):
    u = jnp.ones((1, 1), dtype=jnp.complex64)
    eye2 = jnp.eye(2, dtype=jnp.complex64)
    for i in range(n):                  # qubit 0 = most significant bit
        u = jnp.kron(u, gate2 if i == q else eye2)
    return u


def _cnot(c, t, n):
    dim = 1 << n
    idx = np.arange(dim)
    cbit = (idx >> (n - 1 - c)) & 1
    new_idx = np.where(cbit == 1, idx ^ (1 << (n - 1 - t)), idx)
    P = np.zeros((dim, dim), dtype=np.complex64)
    P[new_idx, idx] = 1.0
    return jnp.asarray(P)


def _yzy_layer(params, n):
    # per-qubit params (ry, rz, ry)
    u = jnp.eye(1 << n, dtype=jnp.complex64)
    for q in range(n):
        g = _ry(params[3 * q + 2]) @ _rz(params[3 * q + 1]) @ _ry(params[3 * q + 0])
        u = _embed(g, q, n) @ u
    return u


def _ring_of_cnot(n):
    u = jnp.eye(1 << n, dtype=jnp.complex64)
    for i in range(n):
        u = _cnot(i, (i + 1) % n, n) @ u
    return u


def build_variational_unitary(w, n_qubits, n_layers):
    N3 = 3 * n_qubits
    U = jnp.eye(1 << n_qubits, dtype=jnp.complex64)
    ring = _ring_of_cnot(n_qubits)
    for l in range(n_layers):
        U = _yzy_layer(w[l * N3:(l + 1) * N3], n_qubits) @ U
        U = ring @ U
    U = _yzy_layer(w[n_layers * N3:(n_layers + 1) * N3], n_qubits) @ U
    return U


def encoding_column(x, n_qubits, axis="Z"):
    # first column of the batched kron U_encoding (only x[:, 0, :n_qubits] is used,
    # exactly like the PyTorch module).
    B = x.shape[0]
    half = 0.5 * x[:, 0, :n_qubits]             # (B, n)
    c = jnp.cos(half)
    s = jnp.sin(half)
    if axis == "Z":
        col0 = c - 1j * s
        col1 = jnp.zeros_like(c) + 0j
    elif axis == "X":
        col0 = c + 0j
        col1 = -1j * s
    elif axis == "Y":
        col0 = c + 0j
        col1 = s + 0j
    else:
        raise ValueError("embedding axis must be one of 'X', 'Y' or 'Z'")
    cols = jnp.stack([col0, col1], axis=-1).astype(jnp.complex64)   # (B, n, 2)
    v = cols[:, 0, :]                                               # (B, 2)
    for q in range(1, n_qubits):
        v = (v[:, :, None] * cols[:, q, None, :]).reshape(B, -1)
    return v                                                        # (B, dim)


# --------------------------------------------------------------------------
# Wrapper: the module forward.
# --------------------------------------------------------------------------
def qulinear_angle_embedding_forward(x, w, n_qubits, n_layers, dimA, axis="Z",
                                     batch_tile=128):
    assert dimA <= n_qubits
    dim = 1 << n_qubits
    dA = 1 << dimA
    dB = 1 << (n_qubits - dimA)
    if x.ndim == 2:
        x = x[None]
    B = x.shape[0]
    assert x.shape == (B, 1, dim)

    Bt = batch_tile                      # lane-dense batch tile (multiple of 128)
    Bp = ((B + Bt - 1) // Bt) * Bt
    n_tiles = Bp // Bt

    # Data-independent variational unitary; rows permuted so that the kept
    # subsystem index is major and the traced-out index is minor, then packed
    # into the real-structured block matrix [[Ur, -Ui], [Ui, Ur]].
    U = build_variational_unitary(w, n_qubits, n_layers)            # (dim, dim) c64
    Uperm = U.reshape(dB, dA, dim).transpose(1, 0, 2).reshape(dA * dB, dim)
    ur = jnp.real(Uperm).astype(jnp.float32)
    ui = jnp.imag(Uperm).astype(jnp.float32)
    u_block = jnp.concatenate(
        [jnp.concatenate([ur, -ui], axis=1),
         jnp.concatenate([ui, ur], axis=1)], axis=0)                # (2*dA*dB, 2*dim)

    # Encoded states, batch along lanes, real over imag, padded to multiple of Bt.
    e = encoding_column(x, n_qubits, axis)                          # (B, dim) c64
    eT = jnp.swapaxes(e, 0, 1)                                      # (dim, B)
    e_block = jnp.concatenate(
        [jnp.real(eT), jnp.imag(eT)], axis=0).astype(jnp.float32)   # (2*dim, B)
    e_block = jnp.pad(e_block, ((0, 0), (0, Bp - B)))               # (2*dim, Bp)

    # Explicit VMEM budget: double-buffered input/output blocks + headroom.
    est = 4 * (2 * (2 * dim * Bt) + (2 * dA * dB) * (2 * dim) + 2 * (2 * dA * dA * Bt))
    vmem_limit = int(min(max(est + (8 << 20), 16 << 20), 64 << 20))
    # TODO(synk): for n_qubits >= ~10, keep U in HBM (memory_space=pl.ANY) and DMA
    #             it once into a VMEM scratch (or K-tile the contraction) instead
    #             of a resident VMEM block per grid step.

    out = pl.pallas_call(
        functools.partial(_qulinear_kernel, dA=dA, dB=dB),
        grid=(n_tiles,),
        in_specs=[
            pl.BlockSpec((2 * dim, Bt), lambda t: (0, t)),
            pl.BlockSpec((2 * dA * dB, 2 * dim), lambda t: (0, 0)),
        ],
        out_specs=pl.BlockSpec((2 * dA * dA, Bt), lambda t: (0, t)),
        out_shape=jax.ShapeDtypeStruct((2 * dA * dA, Bp), jnp.float32),
        compiler_params=pltpu.CompilerParams(
            dimension_semantics=("parallel",),
            vmem_limit_bytes=vmem_limit),
    )(e_block, u_block)

    rdm = (out[:dA * dA, :B] + 1j * out[dA * dA:, :B]).astype(jnp.complex64)  # (dA*dA, B)
    return jnp.swapaxes(rdm, 0, 1).reshape(B, dA, dA)


def _reference(x, w, n_qubits, n_layers, dimA, axis="Z"):
    # pure-JAX reference of the same forward pass (for correctness check)
    dA = 1 << dimA
    dB = 1 << (n_qubits - dimA)
    U = build_variational_unitary(w, n_qubits, n_layers)
    e = encoding_column(x, n_qubits, axis)
    psi = jnp.einsum("ij,bj->bi", U, e.astype(jnp.complex64))
    Psi = psi.reshape(-1, dB, dA)
    return jnp.einsum("bka,bkc->bac", Psi, jnp.conj(Psi))


if __name__ == "__main__":
    # Module config (small): n_qubits=4 -> dim=16, 5 layers, axis='Z'
    n_qubits = 4
    n_layers = 5
    dimA = 2
    axis = "Z"
    batches = 2
    dim = 1 << n_qubits
    N3 = 3 * n_qubits
    n_param = N3 * (n_layers + 1)

    # deterministic parameter init matching the module's __init__:
    # uniform(0, 2*pi) * init_std * w_mul, with use_wscale=True, lrmul=1, gain=sqrt(2)
    gain = 2 ** 0.5
    he_std = gain * 5 ** (-0.5)
    init_std = 1.0
    w_mul = he_std * 1.0

    key = jax.random.PRNGKey(0)
    kx, kw = jax.random.split(key)
    w = (jax.random.uniform(kw, (n_param,), minval=0.0, maxval=2.0 * np.pi)
         * init_std * w_mul).astype(jnp.float32)
    x = jax.random.uniform(kx, (batches, 1, dim), minval=0.0,
                           maxval=2.0 * np.pi).astype(jnp.float32)

    out = qulinear_angle_embedding_forward(x, w, n_qubits, n_layers, dimA, axis)
    out = jax.block_until_ready(out)

    ref = _reference(x, w, n_qubits, n_layers, dimA, axis)
    assert out.shape == (batches, 1 << dimA, 1 << dimA)
    assert out.dtype == jnp.complex64
    if not np.allclose(np.asarray(out), np.asarray(ref), atol=2e-5, rtol=2e-5):
        raise AssertionError("Pallas kernel output mismatch vs reference")
    print("KERNEL_OK")
</pallas_src>

<mosaic_0001>
module attributes {stable_mosaic.version = 11 : i64} {
  func.func @_qulinear_kernel(%arg0: i32, %arg1: memref<32x128xf32, #tpu.memory_space<vmem>>, %arg2: memref<32x32xf32, #tpu.memory_space<vmem>>, %arg3: memref<32x128xf32, #tpu.memory_space<vmem>>) attributes {dimension_semantics = [#tpu.dimension_semantics<parallel>], iteration_bounds = array<i64: 1>, scalar_prefetch = 0 : i64, scratch_operands = 0 : i64, tpu.core_type = #tpu.core_type<tc>, window_params = [{transform_indices = @transform_0, window_bounds = array<i64: 32, 128>}, {pipeline_mode = #tpu.pipeline_mode<synchronous>, transform_indices = @transform_1, window_bounds = array<i64: 32, 32>}, {transform_indices = @transform_2, window_bounds = array<i64: 32, 128>}]} {
    %c0 = arith.constant 0 : index
    %c0_0 = arith.constant 0 : index
    %0 = vector.load %arg2[%c0, %c0_0] : memref<32x32xf32, #tpu.memory_space<vmem>>, vector<32x32xf32>
    %c0_1 = arith.constant 0 : index
    %c0_2 = arith.constant 0 : index
    %1 = vector.load %arg1[%c0_1, %c0_2] : memref<32x128xf32, #tpu.memory_space<vmem>>, vector<32x128xf32>
    %cst = arith.constant dense<0.000000e+00> : vector<32x128xf32>
    %2 = tpu.matmul %0, %1, %cst {dimension_numbers = #tpu.dot_dimension_numbers<[1], [0], [0], [1], [0, 0, 1, 1], [], []>} : vector<32x32xf32>, vector<32x128xf32>, vector<32x128xf32> -> vector<32x128xf32>
    %3 = vector.extract_strided_slice %2 {offsets = [0, 0], sizes = [16, 128], strides = [1, 1]} : vector<32x128xf32> to vector<16x128xf32>
    %4 = vector.extract_strided_slice %2 {offsets = [16, 0], sizes = [16, 128], strides = [1, 1]} : vector<32x128xf32> to vector<16x128xf32>
    %5 = vector.extract_strided_slice %3 {offsets = [0, 0], sizes = [4, 128], strides = [1, 1]} : vector<16x128xf32> to vector<4x128xf32>
    %6 = vector.extract_strided_slice %4 {offsets = [0, 0], sizes = [4, 128], strides = [1, 1]} : vector<16x128xf32> to vector<4x128xf32>
    %7 = vector.extract_strided_slice %3 {offsets = [0, 0], sizes = [4, 128], strides = [1, 1]} : vector<16x128xf32> to vector<4x128xf32>
    %8 = vector.extract_strided_slice %4 {offsets = [0, 0], sizes = [4, 128], strides = [1, 1]} : vector<16x128xf32> to vector<4x128xf32>
    %9 = arith.mulf %5, %7 : vector<4x128xf32>
    %10 = arith.mulf %6, %8 : vector<4x128xf32>
    %11 = arith.addf %9, %10 : vector<4x128xf32>
    %cst_3 = arith.constant dense<0.000000e+00> : vector<128xf32>
    %12 = vector.multi_reduction <add>, %11, %cst_3 [0] : vector<4x128xf32> to vector<128xf32>
    %13 = vector.shape_cast %12 : vector<128xf32> to vector<1x128xf32>
    %14 = arith.mulf %6, %7 : vector<4x128xf32>
    %15 = arith.mulf %5, %8 : vector<4x128xf32>
    %16 = arith.subf %14, %15 : vector<4x128xf32>
    %cst_4 = arith.constant dense<0.000000e+00> : vector<128xf32>
    %17 = vector.multi_reduction <add>, %16, %cst_4 [0] : vector<4x128xf32> to vector<128xf32>
    %18 = vector.shape_cast %17 : vector<128xf32> to vector<1x128xf32>
    %19 = vector.extract_strided_slice %3 {offsets = [4, 0], sizes = [4, 128], strides = [1, 1]} : vector<16x128xf32> to vector<4x128xf32>
    %20 = vector.extract_strided_slice %4 {offsets = [4, 0], sizes = [4, 128], strides = [1, 1]} : vector<16x128xf32> to vector<4x128xf32>
    %21 = arith.mulf %5, %19 : vector<4x128xf32>
    %22 = arith.mulf %6, %20 : vector<4x128xf32>
    %23 = arith.addf %21, %22 : vector<4x128xf32>
    %cst_5 = arith.constant dense<0.000000e+00> : vector<128xf32>
    %24 = vector.multi_reduction <add>, %23, %cst_5 [0] : vector<4x128xf32> to vector<128xf32>
    %25 = vector.shape_cast %24 : vector<128xf32> to vector<1x128xf32>
    %26 = arith.mulf %6, %19 : vector<4x128xf32>
    %27 = arith.mulf %5, %20 : vector<4x128xf32>
    %28 = arith.subf %26, %27 : vector<4x128xf32>
    %cst_6 = arith.constant dense<0.000000e+00> : vector<128xf32>
    %29 = vector.multi_reduction <add>, %28, %cst_6 [0] : vector<4x128xf32> to vector<128xf32>
    %30 = vector.shape_cast %29 : vector<128xf32> to vector<1x128xf32>
    %31 = vector.extract_strided_slice %3 {offsets = [8, 0], sizes = [4, 128], strides = [1, 1]} : vector<16x128xf32> to vector<4x128xf32>
    %32 = vector.extract_strided_slice %4 {offsets = [8, 0], sizes = [4, 128], strides = [1, 1]} : vector<16x128xf32> to vector<4x128xf32>
    %33 = arith.mulf %5, %31 : vector<4x128xf32>
    %34 = arith.mulf %6, %32 : vector<4x128xf32>
    %35 = arith.addf %33, %34 : vector<4x128xf32>
    %cst_7 = arith.constant dense<0.000000e+00> : vector<128xf32>
    %36 = vector.multi_reduction <add>, %35, %cst_7 [0] : vector<4x128xf32> to vector<128xf32>
    %37 = vector.shape_cast %36 : vector<128xf32> to vector<1x128xf32>
    %38 = arith.mulf %6, %31 : vector<4x128xf32>
    %39 = arith.mulf %5, %32 : vector<4x128xf32>
    %40 = arith.subf %38, %39 : vector<4x128xf32>
    %cst_8 = arith.constant dense<0.000000e+00> : vector<128xf32>
    %41 = vector.multi_reduction <add>, %40, %cst_8 [0] : vector<4x128xf32> to vector<128xf32>
    %42 = vector.shape_cast %41 : vector<128xf32> to vector<1x128xf32>
    %43 = vector.extract_strided_slice %3 {offsets = [12, 0], sizes = [4, 128], strides = [1, 1]} : vector<16x128xf32> to vector<4x128xf32>
    %44 = vector.extract_strided_slice %4 {offsets = [12, 0], sizes = [4, 128], strides = [1, 1]} : vector<16x128xf32> to vector<4x128xf32>
    %45 = arith.mulf %5, %43 : vector<4x128xf32>
    %46 = arith.mulf %6, %44 : vector<4x128xf32>
    %47 = arith.addf %45, %46 : vector<4x128xf32>
    %cst_9 = arith.constant dense<0.000000e+00> : vector<128xf32>
    %48 = vector.multi_reduction <add>, %47, %cst_9 [0] : vector<4x128xf32> to vector<128xf32>
    %49 = vector.shape_cast %48 : vector<128xf32> to vector<1x128xf32>
    %50 = arith.mulf %6, %43 : vector<4x128xf32>
    %51 = arith.mulf %5, %44 : vector<4x128xf32>
    %52 = arith.subf %50, %51 : vector<4x128xf32>
    %cst_10 = arith.constant dense<0.000000e+00> : vector<128xf32>
    %53 = vector.multi_reduction <add>, %52, %cst_10 [0] : vector<4x128xf32> to vector<128xf32>
    %54 = vector.shape_cast %53 : vector<128xf32> to vector<1x128xf32>
    %55 = vector.extract_strided_slice %3 {offsets = [4, 0], sizes = [4, 128], strides = [1, 1]} : vector<16x128xf32> to vector<4x128xf32>
    %56 = vector.extract_strided_slice %4 {offsets = [4, 0], sizes = [4, 128], strides = [1, 1]} : vector<16x128xf32> to vector<4x128xf32>
    %57 = vector.extract_strided_slice %3 {offsets = [0, 0], sizes = [4, 128], strides = [1, 1]} : vector<16x128xf32> to vector<4x128xf32>
    %58 = vector.extract_strided_slice %4 {offsets = [0, 0], sizes = [4, 128], strides = [1, 1]} : vector<16x128xf32> to vector<4x128xf32>
    %59 = arith.mulf %55, %57 : vector<4x128xf32>
    %60 = arith.mulf %56, %58 : vector<4x128xf32>
    %61 = arith.addf %59, %60 : vector<4x128xf32>
    %cst_11 = arith.constant dense<0.000000e+00> : vector<128xf32>
    %62 = vector.multi_reduction <add>, %61, %cst_11 [0] : vector<4x128xf32> to vector<128xf32>
    %63 = vector.shape_cast %62 : vector<128xf32> to vector<1x128xf32>
    %64 = arith.mulf %56, %57 : vector<4x128xf32>
    %65 = arith.mulf %55, %58 : vector<4x128xf32>
    %66 = arith.subf %64, %65 : vector<4x128xf32>
    %cst_12 = arith.constant dense<0.000000e+00> : vector<128xf32>
    %67 = vector.multi_reduction <add>, %66, %cst_12 [0] : vector<4x128xf32> to vector<128xf32>
    %68 = vector.shape_cast %67 : vector<128xf32> to vector<1x128xf32>
    %69 = vector.extract_strided_slice %3 {offsets = [4, 0], sizes = [4, 128], strides = [1, 1]} : vector<16x128xf32> to vector<4x128xf32>
    %70 = vector.extract_strided_slice %4 {offsets = [4, 0], sizes = [4, 128], strides = [1, 1]} : vector<16x128xf32> to vector<4x128xf32>
    %71 = arith.mulf %55, %69 : vector<4x128xf32>
    %72 = arith.mulf %56, %70 : vector<4x128xf32>
    %73 = arith.addf %71, %72 : vector<4x128xf32>
    %cst_13 = arith.constant dense<0.000000e+00> : vector<128xf32>
    %74 = vector.multi_reduction <add>, %73, %cst_13 [0] : vector<4x128xf32> to vector<128xf32>
    %75 = vector.shape_cast %74 : vector<128xf32> to vector<1x128xf32>
    %76 = arith.mulf %56, %69 : vector<4x128xf32>
    %77 = arith.mulf %55, %70 : vector<4x128xf32>
    %78 = arith.subf %76, %77 : vector<4x128xf32>
    %cst_14 = arith.constant dense<0.000000e+00> : vector<128xf32>
    %79 = vector.multi_reduction <add>, %78, %cst_14 [0] : vector<4x128xf32> to vector<128xf32>
    %80 = vector.shape_cast %79 : vector<128xf32> to vector<1x128xf32>
    %81 = vector.extract_strided_slice %3 {offsets = [8, 0], sizes = [4, 128], strides = [1, 1]} : vector<16x128xf32> to vector<4x128xf32>
    %82 = vector.extract_strided_slice %4 {offsets = [8, 0], sizes = [4, 128], strides = [1, 1]} : vector<16x128xf32> to vector<4x128xf32>
    %83 = arith.mulf %55, %81 : vector<4x128xf32>
    %84 = arith.mulf %56, %82 : vector<4x128xf32>
    %85 = arith.addf %83, %84 : vector<4x128xf32>
    %cst_15 = arith.constant dense<0.000000e+00> : vector<128xf32>
    %86 = vector.multi_reduction <add>, %85, %cst_15 [0] : vector<4x128xf32> to vector<128xf32>
    %87 = vector.shape_cast %86 : vector<128xf32> to vector<1x128xf32>
    %88 = arith.mulf %56, %81 : vector<4x128xf32>
    %89 = arith.mulf %55, %82 : vector<4x128xf32>
    %90 = arith.subf %88, %89 : vector<4x128xf32>
    %cst_16 = arith.constant dense<0.000000e+00> : vector<128xf32>
    %91 = vector.multi_reduction <add>, %90, %cst_16 [0] : vector<4x128xf32> to vector<128xf32>
    %92 = vector.shape_cast %91 : vector<128xf32> to vector<1x128xf32>
    %93 = vector.extract_strided_slice %3 {offsets = [12, 0], sizes = [4, 128], strides = [1, 1]} : vector<16x128xf32> to vector<4x128xf32>
    %94 = vector.extract_strided_slice %4 {offsets = [12, 0], sizes = [4, 128], strides = [1, 1]} : vector<16x128xf32> to vector<4x128xf32>
    %95 = arith.mulf %55, %93 : vector<4x128xf32>
    %96 = arith.mulf %56, %94 : vector<4x128xf32>
    %97 = arith.addf %95, %96 : vector<4x128xf32>
    %cst_17 = arith.constant dense<0.000000e+00> : vector<128xf32>
    %98 = vector.multi_reduction <add>, %97, %cst_17 [0] : vector<4x128xf32> to vector<128xf32>
    %99 = vector.shape_cast %98 : vector<128xf32> to vector<1x128xf32>
    %100 = arith.mulf %56, %93 : vector<4x128xf32>
    %101 = arith.mulf %55, %94 : vector<4x128xf32>
    %102 = arith.subf %100, %101 : vector<4x128xf32>
    %cst_18 = arith.constant dense<0.000000e+00> : vector<128xf32>
    %103 = vector.multi_reduction <add>, %102, %cst_18 [0] : vector<4x128xf32> to vector<128xf32>
    %104 = vector.shape_cast %103 : vector<128xf32> to vector<1x128xf32>
    %105 = vector.extract_strided_slice %3 {offsets = [8, 0], sizes = [4, 128], strides = [1, 1]} : vector<16x128xf32> to vector<4x128xf32>
    %106 = vector.extract_strided_slice %4 {offsets = [8, 0], sizes = [4, 128], strides = [1, 1]} : vector<16x128xf32> to vector<4x128xf32>
    %107 = vector.extract_strided_slice %3 {offsets = [0, 0], sizes = [4, 128], strides = [1, 1]} : vector<16x128xf32> to vector<4x128xf32>
    %108 = vector.extract_strided_slice %4 {offsets = [0, 0], sizes = [4, 128], strides = [1, 1]} : vector<16x128xf32> to vector<4x128xf32>
    %109 = arith.mulf %105, %107 : vector<4x128xf32>
    %110 = arith.mulf %106, %108 : vector<4x128xf32>
    %111 = arith.addf %109, %110 : vector<4x128xf32>
    %cst_19 = arith.constant dense<0.000000e+00> : vector<128xf32>
    %112 = vector.multi_reduction <add>, %111, %cst_19 [0] : vector<4x128xf32> to vector<128xf32>
    %113 = vector.shape_cast %112 : vector<128xf32> to vector<1x128xf32>
    %114 = arith.mulf %106, %107 : vector<4x128xf32>
    %115 = arith.mulf %105, %108 : vector<4x128xf32>
    %116 = arith.subf %114, %115 : vector<4x128xf32>
    %cst_20 = arith.constant dense<0.000000e+00> : vector<128xf32>
    %117 = vector.multi_reduction <add>, %116, %cst_20 [0] : vector<4x128xf32> to vector<128xf32>
    %118 = vector.shape_cast %117 : vector<128xf32> to vector<1x128xf32>
    %119 = vector.extract_strided_slice %3 {offsets = [4, 0], sizes = [4, 128], strides = [1, 1]} : vector<16x128xf32> to vector<4x128xf32>
    %120 = vector.extract_strided_slice %4 {offsets = [4, 0], sizes = [4, 128], strides = [1, 1]} : vector<16x128xf32> to vector<4x128xf32>
    %121 = arith.mulf %105, %119 : vector<4x128xf32>
    %122 = arith.mulf %106, %120 : vector<4x128xf32>
    %123 = arith.addf %121, %122 : vector<4x128xf32>
    %cst_21 = arith.constant dense<0.000000e+00> : vector<128xf32>
    %124 = vector.multi_reduction <add>, %123, %cst_21 [0] : vector<4x128xf32> to vector<128xf32>
    %125 = vector.shape_cast %124 : vector<128xf32> to vector<1x128xf32>
    %126 = arith.mulf %106, %119 : vector<4x128xf32>
    %127 = arith.mulf %105, %120 : vector<4x128xf32>
    %128 = arith.subf %126, %127 : vector<4x128xf32>
    %cst_22 = arith.constant dense<0.000000e+00> : vector<128xf32>
    %129 = vector.multi_reduction <add>, %128, %cst_22 [0] : vector<4x128xf32> to vector<128xf32>
    %130 = vector.shape_cast %129 : vector<128xf32> to vector<1x128xf32>
    %131 = vector.extract_strided_slice %3 {offsets = [8, 0], sizes = [4, 128], strides = [1, 1]} : vector<16x128xf32> to vector<4x128xf32>
    %132 = vector.extract_strided_slice %4 {offsets = [8, 0], sizes = [4, 128], strides = [1, 1]} : vector<16x128xf32> to vector<4x128xf32>
    %133 = arith.mulf %105, %131 : vector<4x128xf32>
    %134 = arith.mulf %106, %132 : vector<4x128xf32>
    %135 = arith.addf %133, %134 : vector<4x128xf32>
    %cst_23 = arith.constant dense<0.000000e+00> : vector<128xf32>
    %136 = vector.multi_reduction <add>, %135, %cst_23 [0] : vector<4x128xf32> to vector<128xf32>
    %137 = vector.shape_cast %136 : vector<128xf32> to vector<1x128xf32>
    %138 = arith.mulf %106, %131 : vector<4x128xf32>
    %139 = arith.mulf %105, %132 : vector<4x128xf32>
    %140 = arith.subf %138, %139 : vector<4x128xf32>
    %cst_24 = arith.constant dense<0.000000e+00> : vector<128xf32>
    %141 = vector.multi_reduction <add>, %140, %cst_24 [0] : vector<4x128xf32> to vector<128xf32>
    %142 = vector.shape_cast %141 : vector<128xf32> to vector<1x128xf32>
    %143 = vector.extract_strided_slice %3 {offsets = [12, 0], sizes = [4, 128], strides = [1, 1]} : vector<16x128xf32> to vector<4x128xf32>
    %144 = vector.extract_strided_slice %4 {offsets = [12, 0], sizes = [4, 128], strides = [1, 1]} : vector<16x128xf32> to vector<4x128xf32>
    %145 = arith.mulf %105, %143 : vector<4x128xf32>
    %146 = arith.mulf %106, %144 : vector<4x128xf32>
    %147 = arith.addf %145, %146 : vector<4x128xf32>
    %cst_25 = arith.constant dense<0.000000e+00> : vector<128xf32>
    %148 = vector.multi_reduction <add>, %147, %cst_25 [0] : vector<4x128xf32> to vector<128xf32>
    %149 = vector.shape_cast %148 : vector<128xf32> to vector<1x128xf32>
    %150 = arith.mulf %106, %143 : vector<4x128xf32>
    %151 = arith.mulf %105, %144 : vector<4x128xf32>
    %152 = arith.subf %150, %151 : vector<4x128xf32>
    %cst_26 = arith.constant dense<0.000000e+00> : vector<128xf32>
    %153 = vector.multi_reduction <add>, %152, %cst_26 [0] : vector<4x128xf32> to vector<128xf32>
    %154 = vector.shape_cast %153 : vector<128xf32> to vector<1x128xf32>
    %155 = vector.extract_strided_slice %3 {offsets = [12, 0], sizes = [4, 128], strides = [1, 1]} : vector<16x128xf32> to vector<4x128xf32>
    %156 = vector.extract_strided_slice %4 {offsets = [12, 0], sizes = [4, 128], strides = [1, 1]} : vector<16x128xf32> to vector<4x128xf32>
    %157 = vector.extract_strided_slice %3 {offsets = [0, 0], sizes = [4, 128], strides = [1, 1]} : vector<16x128xf32> to vector<4x128xf32>
    %158 = vector.extract_strided_slice %4 {offsets = [0, 0], sizes = [4, 128], strides = [1, 1]} : vector<16x128xf32> to vector<4x128xf32>
    %159 = arith.mulf %155, %157 : vector<4x128xf32>
    %160 = arith.mulf %156, %158 : vector<4x128xf32>
    %161 = arith.addf %159, %160 : vector<4x128xf32>
    %cst_27 = arith.constant dense<0.000000e+00> : vector<128xf32>
    %162 = vector.multi_reduction <add>, %161, %cst_27 [0] : vector<4x128xf32> to vector<128xf32>
    %163 = vector.shape_cast %162 : vector<128xf32> to vector<1x128xf32>
    %164 = arith.mulf %156, %157 : vector<4x128xf32>
    %165 = arith.mulf %155, %158 : vector<4x128xf32>
    %166 = arith.subf %164, %165 : vector<4x128xf32>
    %cst_28 = arith.constant dense<0.000000e+00> : vector<128xf32>
    %167 = vector.multi_reduction <add>, %166, %cst_28 [0] : vector<4x128xf32> to vector<128xf32>
    %168 = vector.shape_cast %167 : vector<128xf32> to vector<1x128xf32>
    %169 = vector.extract_strided_slice %3 {offsets = [4, 0], sizes = [4, 128], strides = [1, 1]} : vector<16x128xf32> to vector<4x128xf32>
    %170 = vector.extract_strided_slice %4 {offsets = [4, 0], sizes = [4, 128], strides = [1, 1]} : vector<16x128xf32> to vector<4x128xf32>
    %171 = arith.mulf %155, %169 : vector<4x128xf32>
    %172 = arith.mulf %156, %170 : vector<4x128xf32>
    %173 = arith.addf %171, %172 : vector<4x128xf32>
    %cst_29 = arith.constant dense<0.000000e+00> : vector<128xf32>
    %174 = vector.multi_reduction <add>, %173, %cst_29 [0] : vector<4x128xf32> to vector<128xf32>
    %175 = vector.shape_cast %174 : vector<128xf32> to vector<1x128xf32>
    %176 = arith.mulf %156, %169 : vector<4x128xf32>
    %177 = arith.mulf %155, %170 : vector<4x128xf32>
    %178 = arith.subf %176, %177 : vector<4x128xf32>
    %cst_30 = arith.constant dense<0.000000e+00> : vector<128xf32>
    %179 = vector.multi_reduction <add>, %178, %cst_30 [0] : vector<4x128xf32> to vector<128xf32>
    %180 = vector.shape_cast %179 : vector<128xf32> to vector<1x128xf32>
    %181 = vector.extract_strided_slice %3 {offsets = [8, 0], sizes = [4, 128], strides = [1, 1]} : vector<16x128xf32> to vector<4x128xf32>
    %182 = vector.extract_strided_slice %4 {offsets = [8, 0], sizes = [4, 128], strides = [1, 1]} : vector<16x128xf32> to vector<4x128xf32>
    %183 = arith.mulf %155, %181 : vector<4x128xf32>
    %184 = arith.mulf %156, %182 : vector<4x128xf32>
    %185 = arith.addf %183, %184 : vector<4x128xf32>
    %cst_31 = arith.constant dense<0.000000e+00> : vector<128xf32>
    %186 = vector.multi_reduction <add>, %185, %cst_31 [0] : vector<4x128xf32> to vector<128xf32>
    %187 = vector.shape_cast %186 : vector<128xf32> to vector<1x128xf32>
    %188 = arith.mulf %156, %181 : vector<4x128xf32>
    %189 = arith.mulf %155, %182 : vector<4x128xf32>
    %190 = arith.subf %188, %189 : vector<4x128xf32>
    %cst_32 = arith.constant dense<0.000000e+00> : vector<128xf32>
    %191 = vector.multi_reduction <add>, %190, %cst_32 [0] : vector<4x128xf32> to vector<128xf32>
    %192 = vector.shape_cast %191 : vector<128xf32> to vector<1x128xf32>
    %193 = vector.extract_strided_slice %3 {offsets = [12, 0], sizes = [4, 128], strides = [1, 1]} : vector<16x128xf32> to vector<4x128xf32>
    %194 = vector.extract_strided_slice %4 {offsets = [12, 0], sizes = [4, 128], strides = [1, 1]} : vector<16x128xf32> to vector<4x128xf32>
    %195 = arith.mulf %155, %193 : vector<4x128xf32>
    %196 = arith.mulf %156, %194 : vector<4x128xf32>
    %197 = arith.addf %195, %196 : vector<4x128xf32>
    %cst_33 = arith.constant dense<0.000000e+00> : vector<128xf32>
    %198 = vector.multi_reduction <add>, %197, %cst_33 [0] : vector<4x128xf32> to vector<128xf32>
    %199 = vector.shape_cast %198 : vector<128xf32> to vector<1x128xf32>
    %200 = arith.mulf %156, %193 : vector<4x128xf32>
    %201 = arith.mulf %155, %194 : vector<4x128xf32>
    %202 = arith.subf %200, %201 : vector<4x128xf32>
    %cst_34 = arith.constant dense<0.000000e+00> : vector<128xf32>
    %203 = vector.multi_reduction <add>, %202, %cst_34 [0] : vector<4x128xf32> to vector<128xf32>
    %204 = vector.shape_cast %203 : vector<128xf32> to vector<1x128xf32>
    %205 = tpu.concatenate %13, %25, %37, %49, %63, %75, %87, %99, %113, %125, %137, %149, %163, %175, %187, %199 in 0 : vector<1x128xf32>, vector<1x128xf32>, vector<1x128xf32>, vector<1x128xf32>, vector<1x128xf32>, vector<1x128xf32>, vector<1x128xf32>, vector<1x128xf32>, vector<1x128xf32>, vector<1x128xf32>, vector<1x128xf32>, vector<1x128xf32>, vector<1x128xf32>, vector<1x128xf32>, vector<1x128xf32>, vector<1x128xf32> -> vector<16x128xf32>
    %206 = tpu.concatenate %18, %30, %42, %54, %68, %80, %92, %104, %118, %130, %142, %154, %168, %180, %192, %204 in 0 : vector<1x128xf32>, vector<1x128xf32>, vector<1x128xf32>, vector<1x128xf32>, vector<1x128xf32>, vector<1x128xf32>, vector<1x128xf32>, vector<1x128xf32>, vector<1x128xf32>, vector<1x128xf32>, vector<1x128xf32>, vector<1x128xf32>, vector<1x128xf32>, vector<1x128xf32>, vector<1x128xf32>, vector<1x128xf32> -> vector<16x128xf32>
    %207 = tpu.concatenate %205, %206 in 0 : vector<16x128xf32>, vector<16x128xf32> -> vector<32x128xf32>
    %c0_35 = arith.constant 0 : index
    %c0_36 = arith.constant 0 : index
    %208 = vector.load %arg3[%c0_35, %c0_36] : memref<32x128xf32, #tpu.memory_space<vmem>>, vector<32x128xf32>
    tpu.vector_store %arg3[%c0_35, %c0_36], %207 {strides = array<i32>} : memref<32x128xf32, #tpu.memory_space<vmem>>, vector<32x128xf32>,
    return
  }
  func.func @transform_0(%arg0: i32) -> (i32, i32) {
    %c0_i32 = arith.constant 0 : i32
    %c0_i32_0 = arith.constant 0 : i32
    return %c0_i32, %arg0 : i32, i32
  }
  func.func @transform_1(%arg0: i32) -> (i32, i32) {
    %c0_i32 = arith.constant 0 : i32
    %c0_i32_0 = arith.constant 0 : i32
    %c0_i32_1 = arith.constant 0 : i32
    return %c0_i32, %c0_i32_0 : i32, i32
  }
  func.func @transform_2(%arg0: i32) -> (i32, i32) {
    %c0_i32 = arith.constant 0 : i32
    %c0_i32_0 = arith.constant 0 : i32
    return %c0_i32, %arg0 : i32, i32
  }
}

</mosaic_0001>

<bundles_post_ra>
// kernel: tpu_custom_call.1
= control target key start
LH: loop header
LB: loop body
LE: loop exit
PB: predicated region body
PF: predicated region fallthrough
CT: control target
= control target key end

     0   :  { %7 = vsyncpa [#allocation3], 0  ;;  %s847_s0 = inlined_call_operand.hbm [shape: f32[32,128], index: 0, kind: input, shape index: {}]   ;;  %s848_s1 = inlined_call_operand.hbm [shape: f32[32,32], index: 1, kind: input, shape index: {}]   ;;  %s849_s2 = inlined_call_operand.hbm [shape: f32[32,128], index: 2, kind: output, shape index: {}]  }
   0x1   :  { %8 = vsyncpa [#allocation6], 0 }
   0x2   :  { %9 = vsyncpa [#allocation4], 0  ;;  %s580_s9 = smov [#allocation2]   ;;  %s508_s13 = scalar_lea.hbm %s847_s0, 512 }
   0x3   :  { %s15_s10 = sshll.u32 %s580_s9, 4  ;;  %p509_p0 = scmp.ne.s32.totalorder %s847_s0, %s508_s13  ;;  %s16_s10 = int_to_ptr.vmem [resolvable:$true] %s15_s10 }
   0x4   :  { %p512_p1 = scmp.lt.u32.totalorder %s508_s13, %s847_s0 }
   0x6   :  { %p514_p2 = pnand %p512_p1, %p509_p0 }
   0x8   :  { %517 = shalt.err (!%p514_p2)
}
   0x9   :  { %s518_s18 = scalar_lea.vmem %s16_s10, 512  ;;  %p523_p4 = scmp.lt.s32.totalorder %s16_s10, %s16_s10 }
   0xa   :  { %p519_p3 = scmp.ne.s32.totalorder %s16_s10, %s518_s18  ;;  %p524_p5 = scmp.lt.s32.totalorder %s518_s18, %s518_s18 }
   0xc   :  { %p525_p6 = por %p524_p5, %p523_p4 }
   0xe   :  { %p526_p7 = pnand %p525_p6, %p519_p3 }
  0x10   :  { %529 = shalt.err (!%p526_p7)
}
  0x11   :  { %s581_s19 = smov 128   ;;  %s582_s20 = smov 8  }
  0x12   :  { %21 = dma.hbm_to_vmem [thread:$0]  %s847_s0, 512, %s16_s10, [#allocation3], %s581_s19, %s581_s19, %s582_s20  }
  0x13   :  { %s583_s23 = smov [#allocation5]   ;;  %s530_s27 = scalar_lea.hbm %s848_s1, 512 }
  0x14   :  { %s27_s24 = sshll.u32 %s583_s23, 4  ;;  %p531_p8 = scmp.ne.s32.totalorder %s848_s1, %s530_s27  ;;  %s28_s24 = int_to_ptr.vmem [resolvable:$true] %s27_s24 }
  0x15   :  { %p534_p9 = scmp.lt.u32.totalorder %s530_s27, %s848_s1 }
  0x17   :  { %p536_p10 = pnand %p534_p9, %p531_p8 }
  0x19   :  { %539 = shalt.err (!%p536_p10)
}
  0x1a   :  { %s540_s4 = scalar_lea.vmem %s28_s24, 512  ;;  %p545_p12 = scmp.lt.s32.totalorder %s28_s24, %s28_s24 }
  0x1b   :  { %p541_p11 = scmp.ne.s32.totalorder %s28_s24, %s540_s4  ;;  %p546_p13 = scmp.lt.s32.totalorder %s540_s4, %s540_s4 }
  0x1d   :  { %p547_p0 = por %p546_p13, %p545_p12 }
  0x1f   :  { %p548_p1 = pnand %p547_p0, %p541_p11 }
  0x21   :  { %551 = shalt.err (!%p548_p1)
}
  0x22   :  { %33 = dma.hbm_to_vmem [thread:$0]  %s848_s1, 512, %s28_s24, [#allocation6], %s581_s19, %s581_s19, %s582_s20  }
  0x23   :  { %574 = dma.done.wait [#allocation3], 512  }
  0x24   :  { %575 = vsyncadd [#allocation3], 4294966784 }
  0x25   :  { %576 = dma.done.wait [#allocation6], 512  }
  0x26   :  { %577 = vsyncadd [#allocation6], 4294966784  ;;  %vm48_vm0 = vcmask 261120   ;;  %v44_v0 = vld [vmem:[#allocation2] sm:$0xff]  ;;  %v45_v1 = vld [vmem:[#allocation2 + $0x8] sm:$0xff]  ;;  %vm149_vm1 = vcmask 1043456  }
  0x27   :  { %v46_v2 = vld [vmem:[#allocation2 + $0x10] sm:$0xff]  ;;  %v491_v3 = vpack.c.bf16 %v45_v1, %v44_v0  ;;  %v47_v4 = vld [vmem:[#allocation2 + $0x18] sm:$0xff]  ;;  %v40_v5 = vld [vmem:[#allocation5] sm:$0xff]  ;;  %vm409_vm2 = vcmask 1040384   ;;  %vm411_vm3 = vcmask 1041408   ;;  %vm413_vm4 = vcmask 1042432  }
  0x28   :  { %v42_v6 = vld [vmem:[#allocation5 + $0x10] sm:$0xff]  ;;  %v495_v7 = vpack.c.bf16 %v47_v4, %v46_v2  ;;  %485 = vmatprep.mubr.msk.f32.mxu0 %vm48_vm0, %v40_v5  ;;  %v41_v8 = vld [vmem:[#allocation5 + $0x8] sm:$0xff]  ;;  %v43_v9 = vld [vmem:[#allocation5 + $0x18] sm:$0xff]  ;;  %vm416_vm5 = vcmask 1044480   ;;  %vm418_vm6 = vcmask 1045504   ;;  %vm420_vm7 = vcmask 1046528  }
  0x29   :  { %488 = vmatprep.mubr.msk.f32.mxu1 %vm48_vm0, %v42_v6  ;;  %492 = vmatprep.subr.bf16.mxu0 %v491_v3  ;;  %s584_s1 = smov [#allocation7]  }
  0x2a   :  { %499 = vmatprep.subr.bf16.mxu1 %v491_v3  ;;  %494 = vmatpush3.bf16.msra.mxu0 %v491_v3  ;;  %s452_s6 = sshll.u32 %s584_s1, 4  ;;  %s453_s6 = int_to_ptr.vmem [resolvable:$true] %s452_s6 }
  0x2b   :  { %501 = vmatpush3.bf16.msra.mxu1 %v491_v3  ;;  %496 = vmatprep.subr.bf16.mxu0 %v495_v7  ;;  %s552_s7 = scalar_lea.vmem %s453_s6, 512  ;;  %p557_p3 = scmp.lt.s32.totalorder %s453_s6, %s453_s6 }
  0x2c   :  { %500 = vmatprep.subr.bf16.mxu1 %v495_v7  ;;  %p553_p2 = scmp.ne.s32.totalorder %s453_s6, %s552_s7  ;;  %p558_p4 = scmp.lt.s32.totalorder %s552_s7, %s552_s7 }
  0x2e   :  { %498 = vmatpush3.bf16.msra.mxu0 %v495_v7  ;;  %p559_p5 = por %p558_p4, %p557_p3 }
  0x2f   :  { %502 = vmatpush3.bf16.msra.mxu1 %v495_v7 }
  0x30   :  { %p560_p6 = pnand %p559_p5, %p553_p2 }
  0x31   :  { %486 = vmatmul.mubr.msk.f32.vlgmr.msra.gmra.mrb[0].mxu0 %vm48_vm0, %v41_v8 }
  0x32   :  { %489 = vmatmul.mubr.msk.f32.vlgmr.msra.gmra.mrb[0].mxu1 %vm48_vm0, %v43_v9 }
 0x104   :  { %v634_v10 = vpop.f32.mrb[0].mxu0 }
 0x105   :  { %v490_v11 = vpop.f32.mrb[0].mxu1  ;;  %v637_v12 = vrot.slane %v634_v10, 4  ;;  %v325_v13 = vmul.f32 %v634_v10, %v634_v10  ;;  %v127_v16 = vpop.f32.mrb[1].mxu0 }
 0x106   :  { %v641_v14 = vrot.slane %v490_v11, 4  ;;  %v326_v15 = vmul.f32 %v490_v11, %v490_v11  ;;  %v643_v17 = vpop.f32.mrb[1].mxu1  ;;  %v335_v18 = vmul.f32 %v490_v11, %v634_v10  ;;  %v192_v19 = vmul.f32 %v634_v10, %v127_v16 }
 0x107   :  { %v344_v20 = vmul.f32 %v634_v10, %v637_v12  ;;  %v354_v23 = vmul.f32 %v490_v11, %v637_v12  ;;  %v167_v26 = vrot.slane %v127_v16, 4  ;;  %v657_v27 = vmul.f32 %v490_v11, %v127_v16 }
 0x108   :  { %v649_v21 = vadd.f32 %v326_v15, %v325_v13  ;;  %v345_v22 = vmul.f32 %v490_v11, %v641_v14  ;;  %v653_v24 = vsub.f32 %v335_v18, %v335_v18  ;;  %v355_v25 = vmul.f32 %v634_v10, %v641_v14 }
 0x109   :  { %v215_v30 = vmul.f32 %v637_v12, %v127_v16  ;;  %v146_v36 = vmul.f32 %v127_v16, %v127_v16  ;;  %v665_v37 = vmul.f32 %v641_v14, %v127_v16  ;;  %v169_v41 = vmul.f32 %v167_v26, %v127_v16 }
 0x10a   :  { %v328_v28 = vsel %vm149_vm1, %v649_v21, 0.0  ;;  %v346_v29 = vadd.f32 %v345_v22, %v344_v20  ;;  %v337_v32 = vsel %vm149_vm1, %v653_v24, 0.0  ;;  %v356_v33 = vsub.f32 %v354_v23, %v355_v25 }
 0x10b   :  { %v329_v31 = vrot.slane %v328_v28, 4  ;;  %v381_v34 = vsub.f32 %v355_v25, %v354_v23  ;;  %v338_v35 = vrot.slane %v337_v32, 4  ;;  %v147_v45 = vmul.f32 %v643_v17, %v643_v17 }
 0x10c   :  { %v668_v39 = vsel %vm149_vm1, %v346_v29, 0.0  ;;  %v357_v40 = vsel %vm149_vm1, %v356_v33, 0.0  ;;  %v157_v47 = vmul.f32 %v643_v17, %v127_v16  ;;  %v171_v48 = vrot.slane %v643_v17, 4 }
 0x10d   :  { %v330_v38 = vadd.f32 %v329_v31, %v328_v28  ;;  %v339_v42 = vadd.f32 %v338_v35, %v337_v32  ;;  %v358_v43 = vrot.slane %v357_v40, 4  ;;  %v672_v44 = vsel %vm149_vm1, %v381_v34, 0.0 }
 0x10e   :  { %v182_v49 = vmul.f32 %v167_v26, %v643_v17  ;;  %v679_v52 = vadd.f32 %v147_v45, %v146_v36  ;;  %v193_v53 = vmul.f32 %v490_v11, %v643_v17  ;;  %v682_v55 = vsub.f32 %v157_v47, %v157_v47 }
 0x10f   :  { %v331_v46 = vrot.slane %v330_v38, 2  ;;  %v340_v50 = vrot.slane %v339_v42, 2  ;;  %v359_v51 = vadd.f32 %v358_v43, %v357_v40  ;;  %v173_v56 = vmul.f32 %v171_v48, %v643_v17 }
 0x110   :  { %v183_v57 = vmul.f32 %v171_v48, %v127_v16  ;;  %v150_v60 = vsel %vm149_vm1, %v679_v52, 0.0  ;;  %v687_v61 = vadd.f32 %v193_v53, %v192_v19  ;;  %v159_v63 = vsel %vm149_vm1, %v682_v55, 0.0 }
 0x111   :  { %v332_v54 = vadd.f32 %v331_v46, %v330_v38  ;;  %v341_v58 = vadd.f32 %v340_v50, %v339_v42  ;;  %v360_v59 = vrot.slane %v359_v51, 2  ;;  %v151_v62 = vrot.slane %v150_v60, 4 }
 0x112   :  { %v174_v0 = vadd.f32 %v173_v56, %v169_v41  ;;  %v390_v1 = vrot.slane %v649_v21, 4  ;;  %v400_v2 = vrot.slane %v653_v24, 4  ;;  %v160_v3 = vrot.slane %v159_v63, 4 }
 0x113   :  { %v184_v4 = vsub.f32 %v182_v49, %v183_v57  ;;  %v348_v5 = vrot.slane %v668_v39, 4  ;;  %v383_v6 = vrot.slane %v672_v44, 4  ;;  %v152_v7 = vadd.f32 %v151_v62, %v150_v60 }
 0x114   :  { %v195_v8 = vsel %vm149_vm1, %v687_v61, 0.0  ;;  %v333_v9 = vrot.slane %v332_v54, 1  ;;  %v342_v11 = vrot.slane %v341_v58, 1  ;;  %v697_v13 = vadd.f32 %v360_v59, %v359_v51 }
 0x115   :  { %v161_v15 = vadd.f32 %v160_v3, %v159_v63  ;;  %v153_v16 = vrot.slane %v152_v7, 2  ;;  %v185_v18 = vsel %vm149_vm1, %v184_v4, 0.0  ;;  %v196_v19 = vrot.slane %v195_v8, 4 }
 0x116   :  { %v202_v20 = vmul.f32 %v634_v10, %v643_v17  ;;  %v186_v23 = vrot.slane %v185_v18, 4  ;;  %v219_v25 = vmul.f32 %v641_v14, %v643_v17  ;;  %v228_v26 = vmul.f32 %v637_v12, %v643_v17 }
 0x117   :  { %v162_v22 = vrot.slane %v161_v15, 2  ;;  %v154_v28 = vadd.f32 %v153_v16, %v152_v7  ;;  %v197_v29 = vadd.f32 %v196_v19, %v195_v8  ;;  %v238_v32 = vsub.f32 %v183_v57, %v182_v49 }
 0x118   :  { %v707_v31 = vsub.f32 %v202_v20, %v657_v27  ;;  %v187_v34 = vadd.f32 %v186_v23, %v185_v18  ;;  %v709_v35 = vadd.f32 %v219_v25, %v215_v30  ;;  %v712_v10 = vsub.f32 %v228_v26, %v665_v37 }
 0x119   :  { %v163_v33 = vadd.f32 %v162_v22, %v161_v15  ;;  %v714_v36 = vadd.f32 %v333_v9, %v332_v54  ;;  %v175_v14 = vsel %vm149_vm1, %v174_v0, 0.0  ;;  %v198_v38 = vrot.slane %v197_v29, 2 }
 0x11a   :  { %v205_v12 = vsel %vm149_vm1, %v707_v31, 0.0  ;;  %v719_v17 = vadd.f32 %v342_v11, %v341_v58  ;;  %v362_v40 = vrot.slane %v697_v13, 1  ;;  %v188_v41 = vrot.slane %v187_v34, 2 }
 0x11b   :  { %v206_v42 = vrot.slane %v205_v12, 4  ;;  %v164_v43 = vrot.slane %v163_v33, 1  ;;  %v221_v30 = vsel %vm149_vm1, %v709_v35, 0.0  ;;  %v231_v45 = vsel %vm149_vm1, %v712_v10, 0.0 }
 0x11c   :  { %v239_v46 = vsel %vm149_vm1, %v238_v32, 0.0  ;;  %v155_v47 = vrot.slane %v154_v28, 1  ;;  %v176_v48 = vrot.slane %v175_v14, 4  ;;  %v232_v50 = vrot.slane %v231_v45, 4 }
 0x11d   :  { %v207_v49 = vadd.f32 %v206_v42, %v205_v12  ;;  %v189_v51 = vadd.f32 %v188_v41, %v187_v34  ;;  %v199_v53 = vadd.f32 %v198_v38, %v197_v29  ;;  %v728_v54 = vsub.f32 %v657_v27, %v202_v20 }
 0x11e   :  { %v314_v56 = vsub.f32 %v665_v37, %v228_v26  ;;  %v222_v58 = vrot.slane %v221_v30, 4  ;;  %v233_v59 = vadd.f32 %v232_v50, %v231_v45  ;;  %v240_v60 = vrot.slane %v239_v46, 4 }
 0x11f   :  { %v208_v57 = vrot.slane %v207_v49, 2  ;;  %v731_v62 = vadd.f32 %v164_v43, %v163_v33  ;;  %v247_v63 = vrot.slane %v679_v52, 4  ;;  %v307_v0 = vsel %vm149_vm1, %v728_v54, 0.0 }
 0x120   :  { %v316_v3 = vrot.slane %v314_v56, 4  ;;  %v234_v7 = vrot.slane %v233_v59, 2  ;;  %v257_v8 = vrot.slane %v682_v55, 4  ;;  %v308_v27 = vrot.slane %v307_v0, 4 }
 0x121   :  { %v209_v4 = vadd.f32 %v208_v57, %v207_v49  ;;  %v190_v9 = vrot.slane %v189_v51, 1  ;;  %v738_v11 = vadd.f32 %v155_v47, %v154_v28  ;;  %v177_v15 = vadd.f32 %v176_v48, %v175_v14 }
 0x122   :  { %v318_v37 = vsel %vm149_vm1, %v316_v3, 0.0  ;;  %v309_v16 = vadd.f32 %v308_v27, %v307_v0  ;;  %v741_v19 = vsel %vm149_vm1, %v314_v56, 0.0  ;;  %v223_v52 = vadd.f32 %v222_v58, %v221_v30 }
 0x123   :  { %v319_v18 = vrot.slane %v318_v37, 4  ;;  %v178_v20 = vrot.slane %v177_v15, 2  ;;  %v200_v22 = vrot.slane %v199_v53, 1  ;;  %v235_v23 = vadd.f32 %v234_v7, %v233_v59 }
 0x124   :  { %v241_v25 = vadd.f32 %v240_v60, %v239_v46  ;;  %v310_v26 = vrot.slane %v309_v16, 2  ;;  %v210_v55 = vrot.slane %v209_v4, 1  ;;  %v224_v32 = vrot.slane %v223_v52, 2 }
 0x125   :  { %v320_v29 = vadd.f32 %v319_v18, %v318_v37  ;;  %v179_v33 = vadd.f32 %v178_v20, %v177_v15  ;;  %v236_v34 = vrot.slane %v235_v23, 1  ;;  %v249_v28 = vsel %vm149_vm1, %v247_v63, 0.0 }
 0x126   :  { %v242_v38 = vrot.slane %v241_v25, 2  ;;  %v365_v14 = vrot.slane %v741_v19, 4  ;;  %v372_v12 = vrot.slane %v728_v54, 4  ;;  %v225_v41 = vadd.f32 %v224_v32, %v223_v52 }
 0x127   :  { %v250_v42 = vrot.slane %v249_v28, 4  ;;  %v746_v43 = vadd.f32 %v190_v9, %v189_v51  ;;  %v748_v30 = vadd.f32 %v200_v22, %v199_v53  ;;  %v259_v46 = vsel %vm149_vm1, %v257_v8, 0.0 }
 0x128   :  { %v243_v45 = vadd.f32 %v242_v38, %v241_v25  ;;  %v311_v47 = vadd.f32 %v310_v26, %v309_v16  ;;  %v321_v48 = vrot.slane %v320_v29, 2  ;;  %v751_v49 = vadd.f32 %v210_v55, %v209_v4 }
 0x129   :  { %v251_v50 = vadd.f32 %v250_v42, %v249_v28  ;;  %v180_v56 = vrot.slane %v179_v33, 1  ;;  %v753_v57 = vadd.f32 %v236_v34, %v235_v23  ;;  %v260_v58 = vrot.slane %v259_v46, 4 }
 0x12a   :  { %v267_v54 = vrot.slane %v709_v35, 4  ;;  %v226_v59 = vrot.slane %v225_v41, 1  ;;  %v277_v51 = vrot.slane %v712_v10, 4  ;;  %v287_v53 = vrot.slane %v687_v61, 4 }
 0x12b   :  { %v252_v60 = vrot.slane %v251_v50, 2  ;;  %v244_v63 = vrot.slane %v243_v45, 1  ;;  %v261_v0 = vadd.f32 %v260_v58, %v259_v46  ;;  %v297_v4 = vrot.slane %v707_v31, 4 }
 0x12c   :  { %v269_v3 = vsel %vm149_vm1, %v267_v54, 0.0  ;;  %v279_v27 = vsel %vm149_vm1, %v277_v51, 0.0  ;;  %v289_v9 = vsel %vm149_vm1, %v287_v53, 0.0  ;;  %v312_v10 = vrot.slane %v311_v47, 1 }
 0x12d   :  { %v253_v7 = vadd.f32 %v252_v60, %v251_v50  ;;  %v270_v8 = vrot.slane %v269_v3, 4  ;;  %v262_v37 = vrot.slane %v261_v0, 2  ;;  %v280_v35 = vrot.slane %v279_v27, 4 }
 0x12e   :  { %v290_v15 = vrot.slane %v289_v9, 4  ;;  %v299_v16 = vsel %vm149_vm1, %v297_v4, 0.0  ;;  %v322_v18 = vadd.f32 %v321_v48, %v320_v29  ;;  %v763_v20 = vadd.f32 %v180_v56, %v179_v33 }
 0x12f   :  { %v271_v61 = vadd.f32 %v270_v8, %v269_v3  ;;  %v300_v52 = vrot.slane %v299_v16, 4  ;;  %v263_v22 = vadd.f32 %v262_v37, %v261_v0  ;;  %v281_v23 = vadd.f32 %v280_v35, %v279_v27 }
 0x130   :  { %v291_v31 = vadd.f32 %v290_v15, %v289_v9  ;;  %v765_v25 = vadd.f32 %v226_v59, %v225_v41  ;;  %v349_v32 = vadd.f32 %v348_v5, %v668_v39  ;;  %v770_v34 = vadd.f32 %v244_v63, %v243_v45 }
 0x131   :  { %v272_v26 = vrot.slane %v271_v61, 2  ;;  %v301_v55 = vadd.f32 %v300_v52, %v299_v16  ;;  %v254_v29 = vrot.slane %v253_v7, 1  ;;  %v282_v38 = vrot.slane %v281_v23, 2 }
 0x132   :  { %v292_v28 = vrot.slane %v291_v31, 2  ;;  %v323_v46 = vrot.slane %v322_v18, 1  ;;  %v350_v48 = vrot.slane %v349_v32, 2  ;;  %v264_v50 = vrot.slane %v263_v22, 1 }
 0x133   :  { %v273_v33 = vadd.f32 %v272_v26, %v271_v61  ;;  %v302_v42 = vrot.slane %v301_v55, 2  ;;  %v283_v41 = vadd.f32 %v282_v38, %v281_v23  ;;  %v366_v58 = vadd.f32 %v365_v14, %v741_v19 }
 0x134   :  { %v293_v56 = vadd.f32 %v292_v28, %v291_v31  ;;  %v351_v39 = vadd.f32 %v350_v48, %v349_v32  ;;  %v374_v5 = vsel %vm149_vm1, %v372_v12, 0.0  ;;  %v255_v45 = vadd.f32 %v254_v29, %v253_v7 }
 0x135   :  { %v274_v54 = vrot.slane %v273_v33, 1  ;;  %v773_v59 = vadd.f32 %v302_v42, %v301_v55  ;;  %v313_v60 = vadd.f32 %v312_v10, %v311_v47  ;;  %v367_v51 = vrot.slane %v366_v58, 2 }
 0x136   :  { %v375_v53 = vrot.slane %v374_v5, 4  ;;  %v324_v0 = vadd.f32 %v323_v46, %v322_v18  ;;  %v363_v3 = vadd.f32 %v362_v40, %v697_v13  ;;  %v384_v19 = vadd.f32 %v383_v6, %v672_v44 }
 0x137   :  { %v275_v63 = vadd.f32 %v274_v54, %v273_v33  ;;  %v265_v14 = vadd.f32 %v264_v50, %v263_v22  ;;  %v284_v4 = vrot.slane %v283_v41, 1  ;;  %v352_v8 = vrot.slane %v351_v39, 1 }
 0x138   :  { %v376_v12 = vadd.f32 %v375_v53, %v374_v5  ;;  %v294_v27 = vrot.slane %v293_v56, 1  ;;  %v304_v47 = vrot.slane %v773_v59, 1  ;;  %v385_v7 = vrot.slane %v384_v19, 2 }
 0x139   :  { %v392_v9 = vsel %vm149_vm1, %v390_v1, 0.0  ;;  %v368_v37 = vadd.f32 %v367_v51, %v366_v58  ;;  %v402_v13 = vsel %vm149_vm1, %v400_v2, 0.0  ;;  %v410_v40 = vsel %vm409_vm2, %v738_v11, %v763_v20 }
 0x13a   :  { %v377_v35 = vrot.slane %v376_v12, 2  ;;  %v393_v15 = vrot.slane %v392_v9, 4  ;;  %v386_v44 = vadd.f32 %v385_v7, %v384_v19  ;;  %v403_v6 = vrot.slane %v402_v13, 4 }
 0x13b   :  { %v422_v16 = vsel %vm409_vm2, %v748_v30, %v275_v63  ;;  %v353_v10 = vadd.f32 %v352_v8, %v351_v39  ;;  %v412_v1 = vsel %vm411_vm3, %v410_v40, %v748_v30  ;;  %v295_v61 = vadd.f32 %v294_v27, %v293_v56 }
 0x13c   :  { %v378_v21 = vadd.f32 %v377_v35, %v376_v12  ;;  %v394_v18 = vadd.f32 %v393_v15, %v392_v9  ;;  %v404_v52 = vadd.f32 %v403_v6, %v402_v13  ;;  %v414_v24 = vsel %vm413_vm4, %v412_v1, %v765_v25 }
 0x13d   :  { %v423_v2 = vsel %vm411_vm3, %v422_v16, %v714_v36  ;;  %v369_v22 = vrot.slane %v368_v37, 1  ;;  %v415_v11 = vsel %vm149_vm1, %v414_v24, %v763_v20  ;;  %v387_v26 = vrot.slane %v386_v44, 1 }
 0x13e   :  { %v395_v23 = vrot.slane %v394_v18, 2  ;;  %v424_v31 = vsel %vm413_vm4, %v423_v2, %v353_v10  ;;  %v405_v55 = vrot.slane %v404_v52, 2  ;;  %v417_v32 = vsel %vm416_vm5, %v415_v11, %v255_v45 }
 0x13f   :  { %v425_v30 = vsel %vm149_vm1, %v424_v31, %v765_v25  ;;  %v379_v29 = vrot.slane %v378_v21, 1  ;;  %v419_v28 = vsel %vm418_vm6, %v417_v32, %v275_v63  ;;  %v429_v46 = vsel %vm409_vm2, %v731_v62, %v746_v43 }
 0x140   :  { %v396_v38 = vadd.f32 %v395_v23, %v394_v18  ;;  %v426_v36 = vsel %vm416_vm5, %v425_v30, %v295_v61  ;;  %v406_v33 = vadd.f32 %v405_v55, %v404_v52  ;;  %v421_v42 = vsel %vm420_vm7, %v419_v28, %v295_v61 }
 0x141   :  { %v427_v20 = vsel %vm418_vm6, %v426_v36, %v353_v10  ;;  %v285_v48 = vadd.f32 %v284_v4, %v283_v41  ;;  %v430_v25 = vsel %vm411_vm3, %v429_v46, %v751_v49  ;;  %v436_v56 = vsel %vm409_vm2, %v313_v60, %v324_v0  ;;  %443 = vst [vmem:[#allocation7] sm:$0xff] %v421_v42 }
 0x142   :  { %v397_v50 = vrot.slane %v396_v38, 1  ;;  %v370_v58 = vadd.f32 %v369_v22, %v368_v37  ;;  %v407_v54 = vrot.slane %v406_v33, 1  ;;  %v431_v39 = vsel %vm413_vm4, %v430_v25, %v753_v57 }
 0x143   :  { %v437_v5 = vsel %vm411_vm3, %v436_v56, %v719_v17  ;;  %v380_v45 = vadd.f32 %v379_v29, %v378_v21  ;;  %v432_v62 = vsel %vm149_vm1, %v431_v39, %v770_v34  ;;  %v305_v49 = vadd.f32 %v304_v47, %v773_v59 }
 0x144   :  { %v398_v51 = vadd.f32 %v397_v50, %v396_v38  ;;  %v438_v43 = vsel %vm413_vm4, %v437_v5, %v363_v3  ;;  %v388_v41 = vadd.f32 %v387_v26, %v386_v44  ;;  %v433_v60 = vsel %vm416_vm5, %v432_v62, %v265_v14 }
 0x145   :  { %v439_v53 = vsel %vm149_vm1, %v438_v43, %v370_v58  ;;  %v408_v57 = vadd.f32 %v407_v54, %v406_v33  ;;  %v434_v17 = vsel %vm418_vm6, %v433_v60, %v285_v48 }
 0x146   :  { %v428_v63 = vsel %vm420_vm7, %v427_v20, %v398_v51  ;;  %v440_v0 = vsel %vm416_vm5, %v439_v53, %v380_v45  ;;  %v435_v34 = vsel %vm420_vm7, %v434_v17, %v305_v49 }
 0x147   :  { %v441_v3 = vsel %vm418_vm6, %v440_v0, %v388_v41  ;;  %444 = vst [vmem:[#allocation7 + $0x8] sm:$0xff] %v428_v63  ;;  %445 = vst [vmem:[#allocation7 + $0x10] sm:$0xff] %v435_v34 }
 0x148   :  { %v442_v59 = vsel %vm420_vm7, %v441_v3, %v408_v57 }
 0x149   :  { %446 = vst [vmem:[#allocation7 + $0x18] sm:$0xff] %v442_v59 }
 0x14a   :  { %563 = shalt.err (!%p560_p6)
}
 0x14b   :  { %s564_s10 = scalar_lea.hbm %s849_s2, 512 }
 0x14c   :  { %p565_p7 = scmp.ne.s32.totalorder %s849_s2, %s564_s10  ;;  %p568_p8 = scmp.lt.u32.totalorder %s564_s10, %s849_s2 }
 0x14e   :  { %p570_p9 = pnand %p568_p8, %p565_p7 }
 0x150   :  { %573 = shalt.err (!%p570_p9)
}
 0x151   :  { %458 = dma.vmem_to_hbm [thread:$0]  %s453_s6, 512, %s849_s2, [#allocation4], %s581_s19, %s581_s19, %s582_s20  }
 0x152   :  { %578 = dma.done.wait [#allocation4], 512  }
 0x153   :  { %579 = vsyncadd [#allocation4], 4294966784 }
 0x154   :  { %462 = vsyncpa [#allocation3], 1 }
 0x155   :  { %463 = vsyncpa [#allocation6], 1 }
 0x156   :  { %464 = vsyncpa [#allocation4], 1 }

</bundles_post_ra>
